<compile_context>
chip_gen: v6e
topology: v6e:2x2x1
jax: 0.10.0
libtpu: 0.0.40
codegen_flags: <defaults>
</compile_context>

<pallas_src>
import math

import jax
import jax.numpy as jnp
from jax.experimental import pallas as pl
from jax.experimental.pallas import tpu as pltpu

LANES = 128  # TPU vreg lane width


def _round_up(x, m):
    return (x + m - 1) // m * m


def _sublane(dtype):
    # Minimum sublane multiple for the second-to-last block dim, by dtype width.
    return {4: 8, 2: 16, 1: 32}[jnp.dtype(dtype).itemsize]


def _choose_tile(rows, cap, sub, min_split_rows=256):
    """Rows per grid tile.

    Big tiles amortize the ~0.35 us per-step overhead; but when there is enough
    work we keep >= 2 tiles so v7x's two TensorCores (grid axis marked
    "parallel") both get a share.  `cap` must be a multiple of `sub`.
    """
    rows_a = _round_up(rows, sub)
    if rows_a > cap:
        return cap                                    # already >= 2 tiles
    if rows_a >= min_split_rows:
        return _round_up(pl.cdiv(rows_a, 2), sub)     # split for megacore
    return rows_a                                     # tiny batch: one tile


# ---------------------------------------------------------------------------
# Packed kernel: used when embedding_dim divides 128.
#   u_ref, i_ref: (TR, 128)  -- G = 128//D batch rows packed per 128-lane row
#   w_ref:        (128, G)   -- block-diagonal predict weight (resident)
#   b_ref:        SMEM (1,)  -- predict bias scalar (f32)
#   o_ref:        (TR, G)    -- f32
# ---------------------------------------------------------------------------
def _gmf_packed_kernel(u_ref, i_ref, w_ref, b_ref, o_ref):
    prod = u_ref[...] * i_ref[...]                                  # VPU, emb dtype
    acc = jnp.dot(prod, w_ref[...], preferred_element_type=jnp.float32)  # MXU
    o_ref[...] = acc + b_ref[0]


# ---------------------------------------------------------------------------
# Fallback kernel: plain (TB, D) row layout, no MXU — elementwise product
# times the weight row, then an in-lane reduction on VPU/XLU.
#   u_ref, i_ref: (TB, D); w_ref: (1, D) f32; b_ref: SMEM (1,); o_ref: (TB, 1)
# ---------------------------------------------------------------------------
def _gmf_rowwise_kernel(u_ref, i_ref, w_ref, b_ref, o_ref):
    prod = u_ref[...].astype(jnp.float32) * i_ref[...].astype(jnp.float32)
    o_ref[...] = jnp.sum(prod * w_ref[...], axis=-1, keepdims=True) + b_ref[0]


def gmf_forward(user, item, embed_user_w, embed_item_w, pred_w, pred_b,
                *, rows_per_tile=4096):
    """user, item: int32 (B,). Returns float32 (B,) predictions.

    Embedding tables may be f32 or bf16; the kernel runs in the table dtype
    (bf16 halves HBM read traffic) and accumulates / outputs in f32.
    """
    B = user.shape[0]
    D = embed_user_w.shape[1]
    emb_dtype = embed_user_w.dtype
    sub = _sublane(emb_dtype)

    w = pred_w.reshape(-1).astype(jnp.float32)                     # (D,)
    b = pred_b.reshape(1).astype(jnp.float32)                      # (1,) scalar

    compiler_params = pltpu.CompilerParams(
        dimension_semantics=("parallel",),       # shard batch tiles across TCs
        vmem_limit_bytes=32 * 1024 * 1024,       # explicit, portable VMEM budget
    )
    cost = pl.CostEstimate(
        flops=4 * B * D,                         # elementwise product + reduce
        transcendentals=0,
        bytes_accessed=2 * B * D * jnp.dtype(emb_dtype).itemsize + B * 4,
    )

    if 0 < D <= LANES and LANES % D == 0:
        # ------------------------- packed path ------------------------------
        G = LANES // D                               # batch rows per packed row
        rows = pl.cdiv(B, G)                         # packed rows needed
        tr = _choose_tile(rows, rows_per_tile, sub)  # packed rows per grid tile
        rows_p = _round_up(_round_up(rows, sub), tr)
        b_padded = rows_p * G

        # Pad the *indices* (not the gathered embeddings) so the gather emits
        # the already-padded arrays — no extra pad/cast pass over HBM.
        pad = b_padded - B
        user_p = jnp.pad(user, (0, pad)) if pad else user
        item_p = jnp.pad(item, (0, pad)) if pad else item
        eu = jnp.take(embed_user_w, user_p, axis=0)  # (b_padded, D), emb dtype
        ei = jnp.take(embed_item_w, item_p, axis=0)
        # Row-major merge: (b_padded, D) -> (rows_p, 128) is a free bitcast.
        eu_p = eu.reshape(rows_p, LANES)
        ei_p = ei.reshape(rows_p, LANES)

        # Block-diagonal predict weight: column g carries w on lanes [g*D,(g+1)*D).
        lane = jnp.arange(LANES)
        w_bd = jnp.where(
            (lane[:, None] // D) == jnp.arange(G)[None, :],
            w[lane % D][:, None],
            0.0,
        ).astype(emb_dtype)                          # (128, G), same dtype as inputs

        out = pl.pallas_call(
            _gmf_packed_kernel,
            out_shape=jax.ShapeDtypeStruct((rows_p, G), jnp.float32),
            grid=(rows_p // tr,),
            in_specs=[
                pl.BlockSpec((tr, LANES), lambda i: (i, 0)),        # packed user emb
                pl.BlockSpec((tr, LANES), lambda i: (i, 0)),        # packed item emb
                pl.BlockSpec((LANES, G), lambda i: (0, 0)),         # resident weight
                pl.BlockSpec(memory_space=pltpu.MemorySpace.SMEM),  # bias scalar
            ],
            out_specs=pl.BlockSpec((tr, G), lambda i: (i, 0)),
            compiler_params=compiler_params,
            cost_estimate=cost,
        )(eu_p, ei_p, w_bd, b)
        return out.reshape(-1)[:B]                   # prediction.view(-1)

    # --------------------- generic fallback (D ∤ 128) ------------------------
    tb = _choose_tile(B, rows_per_tile, sub)
    b_padded = _round_up(_round_up(B, sub), tb)
    pad = b_padded - B
    user_p = jnp.pad(user, (0, pad)) if pad else user
    item_p = jnp.pad(item, (0, pad)) if pad else item
    eu = jnp.take(embed_user_w, user_p, axis=0)       # (b_padded, D), emb dtype
    ei = jnp.take(embed_item_w, item_p, axis=0)

    out = pl.pallas_call(
        _gmf_rowwise_kernel,
        out_shape=jax.ShapeDtypeStruct((b_padded, 1), jnp.float32),
        grid=(b_padded // tb,),
        in_specs=[
            pl.BlockSpec((tb, D), lambda i: (i, 0)),
            pl.BlockSpec((tb, D), lambda i: (i, 0)),
            pl.BlockSpec((1, D), lambda i: (0, 0)),                 # weight row
            pl.BlockSpec(memory_space=pltpu.MemorySpace.SMEM),      # bias scalar
        ],
        out_specs=pl.BlockSpec((tb, 1), lambda i: (i, 0)),
        compiler_params=compiler_params,
        cost_estimate=cost,
    )(eu, ei, w.reshape(1, D), b)
    return out.reshape(-1)[:B]


def init_params(key, user_num, item_num, embedding_dim):
    k_u, k_i, k_w = jax.random.split(key, 3)
    # nn.init.normal_(std=0.01)
    embed_user_w = 0.01 * jax.random.normal(k_u, (user_num, embedding_dim), jnp.float32)
    embed_item_w = 0.01 * jax.random.normal(k_i, (item_num, embedding_dim), jnp.float32)
    # kaiming_uniform_(a=1, 'sigmoid'): gain=1, fan_in=D, bound=sqrt(3/D).
    bound = math.sqrt(3.0 / embedding_dim)
    pred_w = jax.random.uniform(
        k_w, (embedding_dim,), jnp.float32, minval=-bound, maxval=bound
    )
    pred_b = jnp.zeros((1,), jnp.float32)            # bias zeroed, as in the module
    return embed_user_w, embed_item_w, pred_w, pred_b


if __name__ == "__main__":
    user_num = 10
    item_num = 20
    embedding_dim = 32
    batch = 8

    key = jax.random.PRNGKey(0)
    k_params, k_user, k_item = jax.random.split(key, 3)

    embed_user_w, embed_item_w, pred_w, pred_b = init_params(
        k_params, user_num, item_num, embedding_dim
    )

    user = jax.random.randint(k_user, (batch,), 0, user_num, dtype=jnp.int32)
    item = jax.random.randint(k_item, (batch,), 0, item_num, dtype=jnp.int32)

    # Pure-JAX reference.
    eu = jnp.take(embed_user_w, user, axis=0)
    ei = jnp.take(embed_item_w, item, axis=0)
    ref = (eu * ei) @ pred_w + pred_b[0]

    # f32 path: exact-precision check against the reference.
    pred = gmf_forward(user, item, embed_user_w, embed_item_w, pred_w, pred_b)
    pred = jax.block_until_ready(pred)
    assert pred.shape == (batch,)
    assert jnp.allclose(pred, ref, atol=1e-6, rtol=1e-5), (pred, ref)

    # bf16-served embeddings (recommended deployment mode: halves HBM reads).
    pred_bf16 = gmf_forward(
        user, item,
        embed_user_w.astype(jnp.bfloat16), embed_item_w.astype(jnp.bfloat16),
        pred_w, pred_b,
    )
    pred_bf16 = jax.block_until_ready(pred_bf16)
    assert pred_bf16.shape == (batch,)
    assert jnp.allclose(pred_bf16, ref, atol=1e-3, rtol=2e-2), (pred_bf16, ref)

    print("KERNEL_OK")
</pallas_src>

<mosaic_0001>
module attributes {stable_mosaic.version = 11 : i64} {
  func.func @_gmf_packed_kernel(%arg0: i32, %arg1: memref<8x128xf32, #tpu.memory_space<vmem>>, %arg2: memref<8x128xf32, #tpu.memory_space<vmem>>, %arg3: memref<128x4xf32, #tpu.memory_space<vmem>>, %arg4: memref<1xf32, #tpu.memory_space<smem>>, %arg5: memref<8x4xf32, #tpu.memory_space<vmem>>) attributes {dimension_semantics = [#tpu.dimension_semantics<parallel>], iteration_bounds = array<i64: 1>, scalar_prefetch = 0 : i64, scratch_operands = 0 : i64, tpu.core_type = #tpu.core_type<tc>, window_params = [{transform_indices = @transform_0, window_bounds = array<i64: 8, 128>}, {transform_indices = @transform_1, window_bounds = array<i64: 8, 128>}, {pipeline_mode = #tpu.pipeline_mode<synchronous>, transform_indices = @transform_2, window_bounds = array<i64: 128, 4>}, {transform_indices = @transform_3, window_bounds = array<i64: 1>}, {transform_indices = @transform_4, window_bounds = array<i64: 8, 4>}]} {
    %c0 = arith.constant 0 : index
    %c0_0 = arith.constant 0 : index
    %0 = vector.load %arg1[%c0, %c0_0] : memref<8x128xf32, #tpu.memory_space<vmem>>, vector<8x128xf32>
    %c0_1 = arith.constant 0 : index
    %c0_2 = arith.constant 0 : index
    %1 = vector.load %arg2[%c0_1, %c0_2] : memref<8x128xf32, #tpu.memory_space<vmem>>, vector<8x128xf32>
    %2 = arith.mulf %0, %1 : vector<8x128xf32>
    %c0_3 = arith.constant 0 : index
    %c0_4 = arith.constant 0 : index
    %3 = vector.load %arg3[%c0_3, %c0_4] : memref<128x4xf32, #tpu.memory_space<vmem>>, vector<128x4xf32>
    %cst = arith.constant dense<0.000000e+00> : vector<8x4xf32>
    %4 = tpu.matmul %2, %3, %cst {dimension_numbers = #tpu.dot_dimension_numbers<[1], [0], [0], [1], [0, 0, 1, 1], [], []>} : vector<8x128xf32>, vector<128x4xf32>, vector<8x4xf32> -> vector<8x4xf32>
    %c0_5 = arith.constant 0 : index
    %5 = memref.load %arg4[%c0_5] : memref<1xf32, #tpu.memory_space<smem>>
    %6 = vector.broadcast %5 : f32 to vector<8x4xf32>
    %7 = arith.addf %4, %6 : vector<8x4xf32>
    %c0_6 = arith.constant 0 : index
    %c0_7 = arith.constant 0 : index
    %8 = vector.load %arg5[%c0_6, %c0_7] : memref<8x4xf32, #tpu.memory_space<vmem>>, vector<8x4xf32>
    tpu.vector_store %arg5[%c0_6, %c0_7], %7 {strides = array<i32>} : memref<8x4xf32, #tpu.memory_space<vmem>>, vector<8x4xf32>,
    return
  }
  func.func @transform_0(%arg0: i32) -> (i32, i32) {
    %c0_i32 = arith.constant 0 : i32
    %c0_i32_0 = arith.constant 0 : i32
    return %arg0, %c0_i32 : i32, i32
  }
  func.func @transform_1(%arg0: i32) -> (i32, i32) {
    %c0_i32 = arith.constant 0 : i32
    %c0_i32_0 = arith.constant 0 : i32
    return %arg0, %c0_i32 : i32, i32
  }
  func.func @transform_2(%arg0: i32) -> (i32, i32) {
    %c0_i32 = arith.constant 0 : i32
    %c0_i32_0 = arith.constant 0 : i32
    %c0_i32_1 = arith.constant 0 : i32
    return %c0_i32, %c0_i32_0 : i32, i32
  }
  func.func @transform_3(%arg0: i32) -> i32 {
    %c0_i32 = arith.constant 0 : i32
    %c0_i32_0 = arith.constant 0 : i32
    return %c0_i32 : i32
  }
  func.func @transform_4(%arg0: i32) -> (i32, i32) {
    %c0_i32 = arith.constant 0 : i32
    %c0_i32_0 = arith.constant 0 : i32
    return %arg0, %c0_i32 : i32, i32
  }
}

</mosaic_0001>

<bundles_post_ra>
// kernel: tpu_custom_call.1
= control target key start
LH: loop header
LB: loop body
LE: loop exit
PB: predicated region body
PF: predicated region fallthrough
CT: control target
= control target key end

     0   :  { %v169_v0 = vmov 0.0   ;;  %vm170_vm0 = vmmov 0   ;;  %vm109_vm1 = vcmask 31744   ;;  %s256_s2 = inlined_call_operand.vmem [shape: f32[128,4], index: 2, kind: input, shape index: {}]   ;;  %s257_s0 = inlined_call_operand.vmem [shape: f32[8,128], index: 0, kind: input, shape index: {}]   ;;  %s258_s1 = inlined_call_operand.vmem [shape: f32[8,128], index: 1, kind: input, shape index: {}]   ;;  %s259_s3 = inlined_call_operand.<no memory space> [shape: f32[1], index: 3, kind: input, shape index: {}]   ;;  %s260_s4 = inlined_call_operand.vmem [shape: f32[8,4], index: 4, kind: output, shape index: {}]  }
   0x1   :  { %132 = vmatprep.subr.mxu0 %v169_v0  ;;  %v36_v1 = vld [vmem:[%s256_s2 + $0x78] sm:$0xff]  ;;  %v35_v2 = vld [vmem:[%s256_s2 + $0x70] sm:$0xff]  ;;  %164 = vmatprep.mubr.msk.f32.mxu0 %vm170_vm0, %v169_v0  ;;  %v34_v3 = vld [vmem:[%s256_s2 + $0x68] sm:$0xff]  ;;  %v38_v20 = vstv %s259_s3 }
   0x2   :  { %133 = vmatpush3.msra.mxu0 %v36_v1  ;;  %v33_v4 = vld [vmem:[%s256_s2 + $0x60] sm:$0xff]  ;;  %v32_v5 = vld [vmem:[%s256_s2 + $0x58] sm:$0xff]  ;;  %v31_v6 = vld [vmem:[%s256_s2 + $0x50] sm:$0xff] }
   0x3   :  { %134 = vmatprep.subr.mxu0 %v169_v0  ;;  %v30_v7 = vld [vmem:[%s256_s2 + $0x48] sm:$0xff]  ;;  %v29_v8 = vld [vmem:[%s256_s2 + $0x40] sm:$0xff]  ;;  %v28_v9 = vld [vmem:[%s256_s2 + $0x38] sm:$0xff] }
   0x4   :  { %135 = vmatpush3.msra.mxu0 %v35_v2  ;;  %v27_v10 = vld [vmem:[%s256_s2 + $0x30] sm:$0xff]  ;;  %v26_v11 = vld [vmem:[%s256_s2 + $0x28] sm:$0xff]  ;;  %v25_v12 = vld [vmem:[%s256_s2 + $0x20] sm:$0xff] }
   0x5   :  { %136 = vmatprep.subr.mxu0 %v169_v0  ;;  %v24_v13 = vld [vmem:[%s256_s2 + $0x18] sm:$0xff]  ;;  %v23_v14 = vld [vmem:[%s256_s2 + $0x10] sm:$0xff]  ;;  %v18_v15 = vld [vmem:[%s257_s0] sm:$0xff] }
   0x6   :  { %137 = vmatpush3.msra.mxu0 %v34_v3  ;;  %v19_v16 = vld [vmem:[%s258_s1] sm:$0xff]  ;;  %v22_v17 = vld [vmem:[%s256_s2 + $0x8] sm:$0xff] }
   0x7   :  { %138 = vmatprep.subr.mxu0 %v169_v0  ;;  %v21_v18 = vld [vmem:[%s256_s2] sm:$0xff]  ;;  %v20_v19 = vmul.f32 %v19_v16, %v18_v15 }
   0x8   :  { %139 = vmatpush3.msra.mxu0 %v33_v4 }
   0x9   :  { %140 = vmatprep.subr.mxu0 %v169_v0 }
   0xa   :  { %141 = vmatpush3.msra.mxu0 %v32_v5 }
   0xb   :  { %142 = vmatprep.subr.mxu0 %v169_v0 }
   0xc   :  { %143 = vmatpush3.msra.mxu0 %v31_v6 }
   0xd   :  { %144 = vmatprep.subr.mxu0 %v169_v0 }
   0xe   :  { %145 = vmatpush3.msra.mxu0 %v30_v7 }
   0xf   :  { %146 = vmatprep.subr.mxu0 %v169_v0 }
  0x10   :  { %147 = vmatpush3.msra.mxu0 %v29_v8 }
  0x11   :  { %148 = vmatprep.subr.mxu0 %v169_v0 }
  0x12   :  { %149 = vmatpush3.msra.mxu0 %v28_v9 }
  0x13   :  { %150 = vmatprep.subr.mxu0 %v169_v0 }
  0x14   :  { %151 = vmatpush3.msra.mxu0 %v27_v10 }
  0x15   :  { %152 = vmatprep.subr.mxu0 %v169_v0 }
  0x16   :  { %153 = vmatpush3.msra.mxu0 %v26_v11 }
  0x17   :  { %154 = vmatprep.subr.mxu0 %v169_v0 }
  0x18   :  { %155 = vmatpush3.msra.mxu0 %v25_v12 }
  0x19   :  { %156 = vmatprep.subr.mxu0 %v169_v0 }
  0x1a   :  { %157 = vmatpush3.msra.mxu0 %v24_v13 }
  0x1b   :  { %158 = vmatprep.subr.mxu0 %v169_v0 }
  0x1c   :  { %159 = vmatpush3.msra.mxu0 %v23_v14 }
  0x1d   :  { %160 = vmatprep.subr.mxu0 %v169_v0 }
  0x1e   :  { %161 = vmatpush3.msra.mxu0 %v22_v17 }
  0x1f   :  { %162 = vmatprep.subr.mxu0 %v169_v0 }
  0x20   :  { %163 = vmatpush3.msra.mxu0 %v21_v18 }
  0x21   :  { %165 = vmatmul.mubr.f32.vlgmr.msra.gmra.mxu0 %v20_v19 }
  0xe1   :  { %v105_v21 = vpop.f32.mrf.mxu0 }
  0xe2   :  { %v106_v22 = vadd.f32 %v105_v21, %v38_v20 }
  0xe3   :  { %v166_v23 = vpop.f32.mrf.mxu0 }
  0xe4   :  { %110 = vst.msk [vmem:[%s260_s4] sm:$0xff] %vm109_vm1, %v106_v22 }

</bundles_post_ra>
